<compile_context>
chip_gen: v6e
topology: v6e:2x2x1
jax: 0.10.0
libtpu: 0.0.40
codegen_flags: <defaults>
</compile_context>

<pallas_src>
from functools import partial

import jax
import jax.numpy as jnp
from jax import lax
from jax.experimental import pallas as pl
from jax.experimental.pallas import tpu as pltpu

# ---------------- synthetic model configuration ----------------
TASK_NUM_CLASSES = (5, 7, 4)   # get_num_classes(task) for each task
FEATURES = 32                  # config 'net'/'fc1_feature'
VOCAB = 50
EMBED = 8
KERNEL_W = 3                   # conv window of the synthetic CNNEncoder
NTP = 128                      # packed lane width (features AND logits)
COMPUTE_DTYPE = jnp.bfloat16   # matmul operand dtype (accumulation is f32)


def _batch_tile_max():
    """Target MXU LHS rows per pass: 128 on v5e, 256 on v6e/v7x."""
    try:
        kind = jax.devices()[0].device_kind.lower()
    except Exception:
        kind = ""
    return 128 if "v5" in kind else 256


# ---------------- Pallas kernel ----------------
def _make_pipeline_kernel(*, training, tb, Sp, L, num_classes, offsets, cdt):
    """Fused all-task kernel.  `training` is a static Python flag."""
    K, E = KERNEL_W, EMBED
    NT = len(num_classes)

    def encoder_and_combine(emb_ref, convw_ref, combw_ref, bias):
        # conv-as-matmul with the im2col unfold done in-kernel:
        #   conv[b, t] = sum_k emb[b, t+k] @ W_k
        e = emb_ref[...]                                         # (tb*Sp, E) bf16
        conv = None
        for k in range(K):
            mm = jnp.dot(e, convw_ref[k],
                         preferred_element_type=jnp.float32)     # (tb*Sp, NTP) f32
            # leading-axis split stays a view; the k-offset slice keeps exactly
            # the L valid time steps (no pad mask needed).
            mm = mm.reshape(tb, Sp, NTP)[:, k:k + L, :]
            conv = mm if conv is None else conv + mm
        conv = jnp.maximum(conv + bias[0], 0.0)                  # bias + ReLU (f32)
        pooled = jnp.max(conv, axis=1)                           # (tb, NTP) max-pool
        doc = jnp.dot(pooled.astype(cdt), combw_ref[...],
                      preferred_element_type=jnp.float32) + bias[1]
        return doc                                               # (tb, NTP) f32

    if training:
        def kernel(emb_ref, lab_ref, convw_ref, combw_ref, mixw_ref, outw_ref,
                   bias_ref, out_ref):
            bias = bias_ref[...]
            doc = encoder_and_combine(emb_ref, convw_ref, combw_ref, bias)
            # mix_fc driven by ground-truth labels (one packed matmul covers
            # every b<a pair), then one packed out_fc matmul + single store.
            doc = doc + jnp.dot(lab_ref[...], mixw_ref[...],
                                preferred_element_type=jnp.float32) + bias[2]
            out_ref[...] = jnp.dot(doc.astype(cdt), outw_ref[...],
                                   preferred_element_type=jnp.float32) + bias[3]
        return kernel

    def kernel(emb_ref, convw_ref, combw_ref, mixw_ref, outw_ref, bias_ref,
               out_ref):
        bias = bias_ref[...]
        doc = encoder_and_combine(emb_ref, convw_ref, combw_ref, bias)
        mixw = mixw_ref[...]
        outw = outw_ref[...]
        lane = lax.broadcasted_iota(jnp.int32, (tb, NTP), 1)
        lane_f = lane.astype(jnp.float32)
        de = doc + bias[2]                   # mix bias pre-summed per target task
        out_acc = jnp.zeros((tb, NTP), jnp.float32)
        for a in range(NT):                  # NT is tiny & static
            logits = jnp.dot(de.astype(cdt), outw,
                             preferred_element_type=jnp.float32) + bias[3]
            lo = offsets[a]
            hi = lo + num_classes[a]
            valid = (lane >= lo) & (lane < hi)        # task a's lane range
            out_acc = jnp.where(valid, logits, out_acc)
            if a < NT - 1:
                # first-index argmax restricted to task a's lanes, as a 128-lane
                # one-hot; one matmul against the packed mixw cascades it to all
                # later tasks' feature blocks.
                masked = jnp.where(valid, logits, jnp.float32(-1e30))
                m = jnp.max(masked, axis=1, keepdims=True)
                idx = jnp.min(jnp.where(masked >= m, lane_f, jnp.float32(1e9)),
                              axis=1, keepdims=True)
                fmt = (lane_f == idx).astype(cdt)     # (tb, NTP) one-hot
                de = de + jnp.dot(fmt, mixw, preferred_element_type=jnp.float32)
        out_ref[...] = out_acc               # single unmasked (tb, 128) store
    return kernel


def _pipeline_call(training, emb_flat, lab, convw, combw, mixw, outw, bias,
                   *, tb, Sp, L, Bp, num_classes, offsets, cdt):
    E, K = EMBED, KERNEL_W
    NT = len(num_classes)
    grid = (Bp // tb,)

    kernel = _make_pipeline_kernel(training=training, tb=tb, Sp=Sp, L=L,
                                   num_classes=num_classes, offsets=offsets,
                                   cdt=cdt)

    in_specs = [pl.BlockSpec((tb * Sp, E), lambda i: (i, 0))]       # embeddings
    args = [emb_flat]
    if training:
        in_specs.append(pl.BlockSpec((tb, NTP), lambda i: (i, 0)))  # labels
        args.append(lab)
    in_specs += [
        pl.BlockSpec((K, E, NTP), lambda i: (0, 0, 0)),             # conv weights
        pl.BlockSpec((NTP, NTP), lambda i: (0, 0)),                 # combine (blockdiag)
        pl.BlockSpec((NTP, NTP), lambda i: (0, 0)),                 # mix (upper blocks)
        pl.BlockSpec((NTP, NTP), lambda i: (0, 0)),                 # out (lane-packed)
        pl.BlockSpec((4, NTP), lambda i: (0, 0)),                   # conv/comb/mix/out biases
    ]
    args += [convw, combw, mixw, outw, bias]

    # advisory cost hint for XLA scheduling around the gather glue
    flops = (2 * Bp * Sp * E * NTP * K
             + 2 * Bp * NTP * NTP * (2 if training else (NT + NT)))
    bytes_accessed = (emb_flat.size * 2
                      + (Bp * NTP * 2 if training else 0)
                      + (convw.size + combw.size + mixw.size + outw.size) * 2
                      + bias.size * 4 + Bp * NTP * 4)

    return pl.pallas_call(
        kernel,
        out_shape=jax.ShapeDtypeStruct((Bp, NTP), jnp.float32),
        grid_spec=pltpu.PrefetchScalarGridSpec(
            num_scalar_prefetch=0,
            grid=grid,
            in_specs=in_specs,
            out_specs=pl.BlockSpec((tb, NTP), lambda i: (i, 0)),
        ),
        compiler_params=pltpu.CompilerParams(
            dimension_semantics=("parallel",)),
        cost_estimate=pl.CostEstimate(flops=flops, transcendentals=0,
                                      bytes_accessed=bytes_accessed),
    )(*args)


# ---------------- parameter initialization (deterministic, synthetic) ----------------
def init_params(seed=42):
    key = jax.random.PRNGKey(seed)

    def nxt():
        nonlocal key
        key, sub = jax.random.split(key)
        return sub

    nt = len(TASK_NUM_CLASSES)
    p = {}
    p["embedding"] = 0.1 * jax.random.normal(nxt(), (VOCAB, EMBED), jnp.float32)
    # note: all Linear weights are stored as (in_features, out_features)
    p["conv_w"] = [0.1 * jax.random.normal(nxt(), (KERNEL_W * EMBED, FEATURES), jnp.float32)
                   for _ in range(nt)]
    p["conv_b"] = [0.01 * jax.random.normal(nxt(), (FEATURES,), jnp.float32)
                   for _ in range(nt)]
    p["comb_w"] = [0.1 * jax.random.normal(nxt(), (FEATURES, FEATURES), jnp.float32)
                   for _ in range(nt)]
    p["comb_b"] = [0.01 * jax.random.normal(nxt(), (FEATURES,), jnp.float32)
                   for _ in range(nt)]
    p["out_w"] = [0.1 * jax.random.normal(nxt(), (FEATURES, C), jnp.float32)
                  for C in TASK_NUM_CLASSES]
    p["out_b"] = [0.01 * jax.random.normal(nxt(), (C,), jnp.float32)
                  for C in TASK_NUM_CLASSES]
    # mix_fc[b][a] : Linear(num_classes[b], FEATURES)
    p["mix_w"] = [[0.1 * jax.random.normal(nxt(), (TASK_NUM_CLASSES[b], FEATURES), jnp.float32)
                   for _ in range(nt)] for b in range(nt)]
    p["mix_b"] = [[0.01 * jax.random.normal(nxt(), (FEATURES,), jnp.float32)
                   for _ in range(nt)] for b in range(nt)]
    return p


# ---------------- weight packing (glue; tiny, folded by XLA) ----------------
def _pack_params(p, cdt):
    NT = len(TASK_NUM_CLASSES)
    F = FEATURES
    sumC = sum(TASK_NUM_CLASSES)
    assert NT * F <= NTP and sumC <= NTP
    offs, acc = [], 0
    for C in TASK_NUM_CLASSES:
        offs.append(acc)
        acc += C

    convw = jnp.zeros((KERNEL_W, EMBED, NTP), jnp.float32)   # per-tap conv weights
    bconv = jnp.zeros((NTP,), jnp.float32)
    combw = jnp.zeros((NTP, NTP), jnp.float32)               # block-diagonal
    bcomb = jnp.zeros((NTP,), jnp.float32)
    mixw = jnp.zeros((NTP, NTP), jnp.float32)                # class-lane -> feature-lane
    bmix = jnp.zeros((NTP,), jnp.float32)
    outw = jnp.zeros((NTP, NTP), jnp.float32)                # feature-lane -> class-lane
    bout = jnp.zeros((NTP,), jnp.float32)

    for a in range(NT):
        c0, c1 = a * F, (a + 1) * F
        Ca = TASK_NUM_CLASSES[a]
        for k in range(KERNEL_W):
            convw = convw.at[k, :, c0:c1].set(p["conv_w"][a][k * EMBED:(k + 1) * EMBED, :])
        bconv = bconv.at[c0:c1].set(p["conv_b"][a])
        combw = combw.at[c0:c1, c0:c1].set(p["comb_w"][a])
        bcomb = bcomb.at[c0:c1].set(p["comb_b"][a])
        outw = outw.at[c0:c1, offs[a]:offs[a] + Ca].set(p["out_w"][a])
        bout = bout.at[offs[a]:offs[a] + Ca].set(p["out_b"][a])
        for b in range(a):
            Cb = TASK_NUM_CLASSES[b]
            mixw = mixw.at[offs[b]:offs[b] + Cb, c0:c1].set(p["mix_w"][b][a])
            bmix = bmix.at[c0:c1].add(p["mix_b"][b][a])

    bias = jnp.stack([bconv, bcomb, bmix, bout], axis=0)     # (4, NTP) f32
    return dict(convw=convw.astype(cdt), combw=combw.astype(cdt),
                mixw=mixw.astype(cdt), outw=outw.astype(cdt),
                bias=bias, offsets=tuple(offs), sumC=sumC)


# ---------------- Pipeline.forward ----------------
@partial(jax.jit, static_argnames=("training",))
def pipeline_forward(x_ids, doc_len, label, params, training=True):
    del doc_len  # TODO(synk): unused by the synthetic max-pool CNNEncoder
    B, S = x_ids.shape
    K = KERNEL_W
    L = S - K + 1
    Sp = ((S + 7) // 8) * 8                 # sublane-aligned time dim per sample
    cdt = COMPUTE_DTYPE

    tb_max = _batch_tile_max()              # 128 (v5e) / 256 (v6e, v7x)
    Bp8 = ((B + 7) // 8) * 8
    tb = min(tb_max, Bp8)
    Bp = ((Bp8 + tb - 1) // tb) * tb

    packed = _pack_params(params, cdt)

    # glue: embedding gather only (the im2col unfold happens inside the kernel)
    # TODO(synk): the gather itself could also move in-kernel (one-hot matmul
    # against the 50x8 table) to drop this HBM intermediate as well.
    emb = params["embedding"][x_ids]                                   # (B, S, E)
    emb = jnp.pad(emb, ((0, Bp - B), (0, Sp - S), (0, 0)))
    emb_flat = emb.reshape(Bp * Sp, EMBED).astype(cdt)                 # (Bp*Sp, E)

    lab = None
    if training:
        lab = jnp.zeros((Bp, NTP), jnp.float32)
        lab = lab.at[:B, :packed["sumC"]].set(label.astype(jnp.float32))
        lab = lab.astype(cdt)

    out_full = _pipeline_call(
        training, emb_flat, lab,
        packed["convw"], packed["combw"], packed["mixw"], packed["outw"],
        packed["bias"],
        tb=tb, Sp=Sp, L=L, Bp=Bp, num_classes=TASK_NUM_CLASSES,
        offsets=packed["offsets"], cdt=cdt)                            # (Bp, 128)

    outputs = []
    for a, C in enumerate(TASK_NUM_CLASSES):
        off = packed["offsets"][a]
        outputs.append(out_full[:B, off:off + C])
    return outputs


# ---------------- pure-JAX reference (for a loose numerical check) ----------------
def pipeline_reference(x_ids, label, params, training=True):
    B, S = x_ids.shape
    K = KERNEL_W
    L = S - K + 1
    emb = params["embedding"][x_ids]
    xu = jnp.concatenate([emb[:, k:k + L, :] for k in range(K)], axis=-1)

    label_list, acc = [], 0
    for C in TASK_NUM_CLASSES:
        label_list.append(label[:, acc:acc + C].astype(jnp.float32))
        acc += C

    outputs, fmts = [], []
    for a, C in enumerate(TASK_NUM_CLASSES):
        conv = jnp.einsum("blk,kf->blf", xu, params["conv_w"][a]) + params["conv_b"][a]
        pooled = jnp.max(jax.nn.relu(conv), axis=1)
        de = pooled @ params["comb_w"][a] + params["comb_b"][a]
        for b in range(a):
            src = label_list[b] if training else fmts[b]
            de = de + src @ params["mix_w"][b][a] + params["mix_b"][b][a]
        out = de @ params["out_w"][a] + params["out_b"][a]
        outputs.append(out)
        fmts.append(jax.nn.one_hot(jnp.argmax(out, axis=1), C, dtype=jnp.float32))
    return outputs


# ---------------- demo ----------------
if __name__ == "__main__":
    B, S = 2, 16
    key = jax.random.PRNGKey(0)
    k_x, k_lab = jax.random.split(key)

    x_ids = jax.random.randint(k_x, (B, S), 0, VOCAB, dtype=jnp.int32)
    doc_len = jnp.full((B,), S, dtype=jnp.int32)

    # label: concatenated per-task one-hot targets, shape (B, sum(num_classes))
    lab_keys = jax.random.split(k_lab, len(TASK_NUM_CLASSES))
    label = jnp.concatenate(
        [jax.nn.one_hot(jax.random.randint(lab_keys[i], (B,), 0, C), C,
                        dtype=jnp.float32)
         for i, C in enumerate(TASK_NUM_CLASSES)], axis=1)

    params = init_params(seed=42)

    outs_train = pipeline_forward(x_ids, doc_len, label, params, training=True)
    outs_eval = pipeline_forward(x_ids, doc_len, label, params, training=False)
    for o in outs_train + outs_eval:
        jax.block_until_ready(o)

    expected = [(B, C) for C in TASK_NUM_CLASSES]
    assert [tuple(o.shape) for o in outs_train] == expected
    assert [tuple(o.shape) for o in outs_eval] == expected
    assert all(bool(jnp.all(jnp.isfinite(o))) for o in outs_train + outs_eval)

    # loose check of the training path against a pure-JAX f32 reference
    # (kernel matmul operands are bf16, accumulation is f32)
    ref_train = pipeline_reference(x_ids, label, params, training=True)
    for o, r in zip(outs_train, ref_train):
        assert bool(jnp.allclose(o, r, atol=3e-2, rtol=3e-2)), \
            float(jnp.max(jnp.abs(o - r)))

    # task 0 has no mix-feedback dependence, so the eval kernel must reproduce
    # the same logits as the reference regardless of argmax decisions.
    assert bool(jnp.allclose(outs_eval[0], ref_train[0], atol=3e-2, rtol=3e-2)), \
        float(jnp.max(jnp.abs(outs_eval[0] - ref_train[0])))

    print("KERNEL_OK")
</pallas_src>

<mosaic_0001>
module attributes {stable_mosaic.version = 11 : i64} {
  func.func @kernel(%arg0: i32, %arg1: memref<128x8xbf16, #tpu.memory_space<vmem>>, %arg2: memref<8x128xbf16, #tpu.memory_space<vmem>>, %arg3: memref<3x8x128xbf16, #tpu.memory_space<vmem>>, %arg4: memref<128x128xbf16, #tpu.memory_space<vmem>>, %arg5: memref<128x128xbf16, #tpu.memory_space<vmem>>, %arg6: memref<128x128xbf16, #tpu.memory_space<vmem>>, %arg7: memref<4x128xf32, #tpu.memory_space<vmem>>, %arg8: memref<8x128xf32, #tpu.memory_space<vmem>>) attributes {dimension_semantics = [#tpu.dimension_semantics<parallel>], iteration_bounds = array<i64: 1>, scalar_prefetch = 0 : i64, scratch_operands = 0 : i64, tpu.core_type = #tpu.core_type<tc>, window_params = [{transform_indices = @transform_0, window_bounds = array<i64: 128, 8>}, {transform_indices = @transform_1, window_bounds = array<i64: 8, 128>}, {pipeline_mode = #tpu.pipeline_mode<synchronous>, transform_indices = @transform_2, window_bounds = array<i64: 3, 8, 128>}, {pipeline_mode = #tpu.pipeline_mode<synchronous>, transform_indices = @transform_3, window_bounds = array<i64: 128, 128>}, {pipeline_mode = #tpu.pipeline_mode<synchronous>, transform_indices = @transform_4, window_bounds = array<i64: 128, 128>}, {pipeline_mode = #tpu.pipeline_mode<synchronous>, transform_indices = @transform_5, window_bounds = array<i64: 128, 128>}, {pipeline_mode = #tpu.pipeline_mode<synchronous>, transform_indices = @transform_6, window_bounds = array<i64: 4, 128>}, {transform_indices = @transform_7, window_bounds = array<i64: 8, 128>}]} {
    %c0 = arith.constant 0 : index
    %c0_0 = arith.constant 0 : index
    %0 = vector.load %arg7[%c0, %c0_0] : memref<4x128xf32, #tpu.memory_space<vmem>>, vector<4x128xf32>
    %c0_1 = arith.constant 0 : index
    %c0_2 = arith.constant 0 : index
    %1 = vector.load %arg1[%c0_1, %c0_2] : memref<128x8xbf16, #tpu.memory_space<vmem>>, vector<128x8xbf16>
    %c0_3 = arith.constant 0 : index
    %c0_4 = arith.constant 0 : index
    %c0_5 = arith.constant 0 : index
    %2 = vector.load %arg3[%c0_3, %c0_4, %c0_5] : memref<3x8x128xbf16, #tpu.memory_space<vmem>>, vector<1x8x128xbf16>
    %3 = vector.shape_cast %2 : vector<1x8x128xbf16> to vector<8x128xbf16>
    %cst = arith.constant dense<0.000000e+00> : vector<128x128xf32>
    %4 = tpu.matmul %1, %3, %cst {dimension_numbers = #tpu.dot_dimension_numbers<[1], [0], [0], [1], [0, 0, 1, 1], [], []>} : vector<128x8xbf16>, vector<8x128xbf16>, vector<128x128xf32> -> vector<128x128xf32>
    %5 = vector.shape_cast %4 : vector<128x128xf32> to vector<8x16x128xf32>
    %6 = vector.extract_strided_slice %5 {offsets = [0, 0, 0], sizes = [8, 14, 128], strides = [1, 1, 1]} : vector<8x16x128xf32> to vector<8x14x128xf32>
    %c1 = arith.constant 1 : index
    %c0_6 = arith.constant 0 : index
    %c0_7 = arith.constant 0 : index
    %7 = vector.load %arg3[%c1, %c0_6, %c0_7] : memref<3x8x128xbf16, #tpu.memory_space<vmem>>, vector<1x8x128xbf16>
    %8 = vector.shape_cast %7 : vector<1x8x128xbf16> to vector<8x128xbf16>
    %cst_8 = arith.constant dense<0.000000e+00> : vector<128x128xf32>
    %9 = tpu.matmul %1, %8, %cst_8 {dimension_numbers = #tpu.dot_dimension_numbers<[1], [0], [0], [1], [0, 0, 1, 1], [], []>} : vector<128x8xbf16>, vector<8x128xbf16>, vector<128x128xf32> -> vector<128x128xf32>
    %10 = vector.shape_cast %9 : vector<128x128xf32> to vector<8x16x128xf32>
    %11 = vector.extract_strided_slice %10 {offsets = [0, 1, 0], sizes = [8, 14, 128], strides = [1, 1, 1]} : vector<8x16x128xf32> to vector<8x14x128xf32>
    %12 = arith.addf %6, %11 : vector<8x14x128xf32>
    %c2 = arith.constant 2 : index
    %c0_9 = arith.constant 0 : index
    %c0_10 = arith.constant 0 : index
    %13 = vector.load %arg3[%c2, %c0_9, %c0_10] : memref<3x8x128xbf16, #tpu.memory_space<vmem>>, vector<1x8x128xbf16>
    %14 = vector.shape_cast %13 : vector<1x8x128xbf16> to vector<8x128xbf16>
    %cst_11 = arith.constant dense<0.000000e+00> : vector<128x128xf32>
    %15 = tpu.matmul %1, %14, %cst_11 {dimension_numbers = #tpu.dot_dimension_numbers<[1], [0], [0], [1], [0, 0, 1, 1], [], []>} : vector<128x8xbf16>, vector<8x128xbf16>, vector<128x128xf32> -> vector<128x128xf32>
    %16 = vector.shape_cast %15 : vector<128x128xf32> to vector<8x16x128xf32>
    %17 = vector.extract_strided_slice %16 {offsets = [0, 2, 0], sizes = [8, 14, 128], strides = [1, 1, 1]} : vector<8x16x128xf32> to vector<8x14x128xf32>
    %18 = arith.addf %12, %17 : vector<8x14x128xf32>
    %19 = vector.extract_strided_slice %0 {offsets = [0, 0], sizes = [1, 128], strides = [1, 1]} : vector<4x128xf32> to vector<1x128xf32>
    %20 = vector.shape_cast %19 : vector<1x128xf32> to vector<128xf32>
    %21 = vector.shape_cast %20 : vector<128xf32> to vector<1x1x128xf32>
    %22 = vector.broadcast %21 : vector<1x1x128xf32> to vector<8x14x128xf32>
    %23 = arith.addf %18, %22 : vector<8x14x128xf32>
    %cst_12 = arith.constant 0.000000e+00 : f32
    %24 = vector.broadcast %cst_12 : f32 to vector<8x14x128xf32>
    %25 = arith.maximumf %23, %24 : vector<8x14x128xf32>
    %cst_13 = arith.constant dense<0xFF800000> : vector<8x128xf32>
    %26 = vector.multi_reduction <maximumf>, %25, %cst_13 [1] : vector<8x14x128xf32> to vector<8x128xf32>
    %27 = arith.truncf %26 : vector<8x128xf32> to vector<8x128xbf16>
    %c0_14 = arith.constant 0 : index
    %c0_15 = arith.constant 0 : index
    %28 = vector.load %arg4[%c0_14, %c0_15] : memref<128x128xbf16, #tpu.memory_space<vmem>>, vector<128x128xbf16>
    %cst_16 = arith.constant dense<0.000000e+00> : vector<8x128xf32>
    %29 = tpu.matmul %27, %28, %cst_16 {dimension_numbers = #tpu.dot_dimension_numbers<[1], [0], [0], [1], [0, 0, 1, 1], [], []>} : vector<8x128xbf16>, vector<128x128xbf16>, vector<8x128xf32> -> vector<8x128xf32>
    %30 = vector.extract_strided_slice %0 {offsets = [1, 0], sizes = [1, 128], strides = [1, 1]} : vector<4x128xf32> to vector<1x128xf32>
    %31 = vector.shape_cast %30 : vector<1x128xf32> to vector<128xf32>
    %32 = vector.shape_cast %31 : vector<128xf32> to vector<1x128xf32>
    %33 = vector.broadcast %32 : vector<1x128xf32> to vector<8x128xf32>
    %34 = arith.addf %29, %33 : vector<8x128xf32>
    %c0_17 = arith.constant 0 : index
    %c0_18 = arith.constant 0 : index
    %35 = vector.load %arg2[%c0_17, %c0_18] : memref<8x128xbf16, #tpu.memory_space<vmem>>, vector<8x128xbf16>
    %c0_19 = arith.constant 0 : index
    %c0_20 = arith.constant 0 : index
    %36 = vector.load %arg5[%c0_19, %c0_20] : memref<128x128xbf16, #tpu.memory_space<vmem>>, vector<128x128xbf16>
    %cst_21 = arith.constant dense<0.000000e+00> : vector<8x128xf32>
    %37 = tpu.matmul %35, %36, %cst_21 {dimension_numbers = #tpu.dot_dimension_numbers<[1], [0], [0], [1], [0, 0, 1, 1], [], []>} : vector<8x128xbf16>, vector<128x128xbf16>, vector<8x128xf32> -> vector<8x128xf32>
    %38 = arith.addf %34, %37 : vector<8x128xf32>
    %39 = vector.extract_strided_slice %0 {offsets = [2, 0], sizes = [1, 128], strides = [1, 1]} : vector<4x128xf32> to vector<1x128xf32>
    %40 = vector.shape_cast %39 : vector<1x128xf32> to vector<128xf32>
    %41 = vector.shape_cast %40 : vector<128xf32> to vector<1x128xf32>
    %42 = vector.broadcast %41 : vector<1x128xf32> to vector<8x128xf32>
    %43 = arith.addf %38, %42 : vector<8x128xf32>
    %44 = arith.truncf %43 : vector<8x128xf32> to vector<8x128xbf16>
    %c0_22 = arith.constant 0 : index
    %c0_23 = arith.constant 0 : index
    %45 = vector.load %arg6[%c0_22, %c0_23] : memref<128x128xbf16, #tpu.memory_space<vmem>>, vector<128x128xbf16>
    %cst_24 = arith.constant dense<0.000000e+00> : vector<8x128xf32>
    %46 = tpu.matmul %44, %45, %cst_24 {dimension_numbers = #tpu.dot_dimension_numbers<[1], [0], [0], [1], [0, 0, 1, 1], [], []>} : vector<8x128xbf16>, vector<128x128xbf16>, vector<8x128xf32> -> vector<8x128xf32>
    %47 = vector.extract_strided_slice %0 {offsets = [3, 0], sizes = [1, 128], strides = [1, 1]} : vector<4x128xf32> to vector<1x128xf32>
    %48 = vector.shape_cast %47 : vector<1x128xf32> to vector<128xf32>
    %49 = vector.shape_cast %48 : vector<128xf32> to vector<1x128xf32>
    %50 = vector.broadcast %49 : vector<1x128xf32> to vector<8x128xf32>
    %51 = arith.addf %46, %50 : vector<8x128xf32>
    %c0_25 = arith.constant 0 : index
    %c0_26 = arith.constant 0 : index
    %52 = vector.load %arg8[%c0_25, %c0_26] : memref<8x128xf32, #tpu.memory_space<vmem>>, vector<8x128xf32>
    tpu.vector_store %arg8[%c0_25, %c0_26], %51 {strides = array<i32>} : memref<8x128xf32, #tpu.memory_space<vmem>>, vector<8x128xf32>,
    return
  }
  func.func @transform_0(%arg0: i32) -> (i32, i32) {
    %c0_i32 = arith.constant 0 : i32
    %c0_i32_0 = arith.constant 0 : i32
    return %arg0, %c0_i32 : i32, i32
  }
  func.func @transform_1(%arg0: i32) -> (i32, i32) {
    %c0_i32 = arith.constant 0 : i32
    %c0_i32_0 = arith.constant 0 : i32
    return %arg0, %c0_i32 : i32, i32
  }
  func.func @transform_2(%arg0: i32) -> (i32, i32, i32) {
    %c0_i32 = arith.constant 0 : i32
    %c0_i32_0 = arith.constant 0 : i32
    %c0_i32_1 = arith.constant 0 : i32
    %c0_i32_2 = arith.constant 0 : i32
    return %c0_i32, %c0_i32_0, %c0_i32_1 : i32, i32, i32
  }
  func.func @transform_3(%arg0: i32) -> (i32, i32) {
    %c0_i32 = arith.constant 0 : i32
    %c0_i32_0 = arith.constant 0 : i32
    %c0_i32_1 = arith.constant 0 : i32
    return %c0_i32, %c0_i32_0 : i32, i32
  }
  func.func @transform_4(%arg0: i32) -> (i32, i32) {
    %c0_i32 = arith.constant 0 : i32
    %c0_i32_0 = arith.constant 0 : i32
    %c0_i32_1 = arith.constant 0 : i32
    return %c0_i32, %c0_i32_0 : i32, i32
  }
  func.func @transform_5(%arg0: i32) -> (i32, i32) {
    %c0_i32 = arith.constant 0 : i32
    %c0_i32_0 = arith.constant 0 : i32
    %c0_i32_1 = arith.constant 0 : i32
    return %c0_i32, %c0_i32_0 : i32, i32
  }
  func.func @transform_6(%arg0: i32) -> (i32, i32) {
    %c0_i32 = arith.constant 0 : i32
    %c0_i32_0 = arith.constant 0 : i32
    %c0_i32_1 = arith.constant 0 : i32
    return %c0_i32, %c0_i32_0 : i32, i32
  }
  func.func @transform_7(%arg0: i32) -> (i32, i32) {
    %c0_i32 = arith.constant 0 : i32
    %c0_i32_0 = arith.constant 0 : i32
    return %arg0, %c0_i32 : i32, i32
  }
}

</mosaic_0001>

<bundles_post_ra>
// kernel: pipeline_forward.1
= control target key start
LH: loop header
LB: loop body
LE: loop exit
PB: predicated region body
PF: predicated region fallthrough
CT: control target
= control target key end

     0   :  { %vm110_vm0 = vcmask 1043456   ;;  %vm85_vm1 = vcmask 64512   ;;  %v1297_v15 = vmov 0.0   ;;  %vm1298_vm2 = vmmov 0   ;;  %s1606_s2 = inlined_call_operand.vmem [shape: bf16[3,8,128], index: 2, kind: input, shape index: {}]   ;;  %s1607_s0 = inlined_call_operand.vmem [shape: bf16[128,8], index: 0, kind: input, shape index: {}]   ;;  %s1608_s4 = inlined_call_operand.vmem [shape: bf16[128,128], index: 4, kind: input, shape index: {}]   ;;  %s1609_s3 = inlined_call_operand.vmem [shape: bf16[128,128], index: 3, kind: input, shape index: {}]   ;;  %s1610_s1 = inlined_call_operand.vmem [shape: bf16[8,128], index: 1, kind: input, shape index: {}]   ;;  %s1611_s5 = inlined_call_operand.vmem [shape: bf16[128,128], index: 5, kind: input, shape index: {}]   ;;  %s1612_s6 = inlined_call_operand.vmem [shape: f32[4,128], index: 6, kind: input, shape index: {}]   ;;  %s1613_s7 = inlined_call_operand.vmem [shape: f32[8,128], index: 7, kind: output, shape index: {}]  }
   0x1   :  { %v44_v0 = vld [vmem:[%s1606_s2] sm:$0xf]  ;;  %v1050_v1 = vld [vmem:[%s1606_s2 + $0x4] sm:$0xf]  ;;  %v1266_v5 = vld [vmem:[%s1607_s0 + $0x8] sm:$0xff]   ;;  %v561_v53 = vlaneseq  ;;  %vm329_vm3 = vcmask 1046528  }
   0x2   :  { %1260 = vmatprep.subr.msk.bf16.mxu0 %vm110_vm0, %v44_v0  ;;  %1261 = vmatprep.subr.msk.bf16.mxu1 %vm110_vm0, %v1050_v1  ;;  %v112_v2 = vsel %vm110_vm0, %v44_v0, 0  ;;  %v214_v3 = vsel %vm110_vm0, %v1050_v1, 0  ;;  %v1265_v4 = vld [vmem:[%s1607_s0] sm:$0xff]   ;;  %v1059_v6 = vld [vmem:[%s1606_s2 + $0x8] sm:$0xf]  ;;  %v1267_v8 = vld [vmem:[%s1607_s0 + $0x10] sm:$0xff]  }
   0x3   :  { %1147 = vmatpush3.bf16.msra.mxu0 %v112_v2  ;;  %1165 = vmatpush3.bf16.msra.mxu1 %v214_v3  ;;  %v389_v7 = vsel %vm110_vm0, %v1059_v6, 0  ;;  %v1268_v9 = vld [vmem:[%s1607_s0 + $0x18] sm:$0xff]   ;;  %v1269_v10 = vld [vmem:[%s1607_s0 + $0x20] sm:$0xff]   ;;  %v1270_v11 = vld [vmem:[%s1607_s0 + $0x28] sm:$0xff]   ;;  %v1492_v57 = vshrl.u32 %v561_v53, 7  ;;  %vm504_vm4 = vcmask 1045504  }
   0x4   :  { %1148 = vmatprep.mubr.msk.bf16.mxu0 %vm85_vm1, %v1265_v4  ;;  %1166 = vmatprep.mubr.msk.bf16.mxu1 %vm85_vm1, %v1265_v4  ;;  %v1271_v12 = vld [vmem:[%s1607_s0 + $0x30] sm:$0xff]   ;;  %v1272_v13 = vld [vmem:[%s1607_s0 + $0x38] sm:$0xff]   ;;  %v1277_v19 = vld [vmem:[%s1608_s4 + $0x28] sm:$0xff]   ;;  %vm705_vm5 = vcmask 1041409   ;;  %vm707_vm6 = vcmask 1042434   ;;  %vm709_vm7 = vcmask 1043459  }
   0x5   :  { %1262 = vmatprep.subr.msk.bf16.mxu0 %vm110_vm0, %v1059_v6  ;;  %v1273_v14 = vld [vmem:[%s1608_s4 + $0x38] sm:$0xff]   ;;  %1200 = vmatprep.subr.bf16.mxu1 %v1297_v15  ;;  %v1275_v17 = vld [vmem:[%s1608_s4 + $0x30] sm:$0xff]   ;;  %v1278_v20 = vld [vmem:[%s1609_s3 + $0x28] sm:$0xff]   ;;  %v563_v63 = vsub.s32 0, %v1492_v57  ;;  %vm711_vm8 = vcmask 1044484   ;;  %vm713_vm9 = vcmask 1045509  }
   0x6   :  { %1149 = vmatmul.mubr.msk.bf16.vlgmr.msra.gmra.mxu0 %vm85_vm1, %v1266_v5  ;;  %1167 = vmatmul.mubr.msk.bf16.vlgmr.msra.gmra.mxu1 %vm85_vm1, %v1266_v5  ;;  %v1274_v16 = vld [vmem:[%s1609_s3 + $0x38] sm:$0xff]   ;;  %v1276_v18 = vld [vmem:[%s1609_s3 + $0x30] sm:$0xff]   ;;  %v1279_v21 = vld [vmem:[%s1608_s4 + $0x20] sm:$0xff]   ;;  %vm715_vm10 = vcmask 1046534   ;;  %vm717_vm11 = vcmask 1047559  }
   0x7   :  { %1183 = vmatpush3.bf16.msra.mxu0 %v389_v7  ;;  %1152 = vmatprep.mubr.msk.bf16.mxu0 %vm85_vm1, %v1267_v8  ;;  %v1280_v22 = vld [vmem:[%s1609_s3 + $0x20] sm:$0xff]   ;;  %v1281_v23 = vld [vmem:[%s1608_s4 + $0x18] sm:$0xff]   ;;  %v1283_v25 = vld [vmem:[%s1608_s4 + $0x10] sm:$0xff]  }
   0x8   :  { %1170 = vmatprep.mubr.msk.bf16.mxu1 %vm85_vm1, %v1267_v8  ;;  %1220 = vmatprep.subr.bf16.mxu0 %v1297_v15  ;;  %v1282_v24 = vld [vmem:[%s1609_s3 + $0x18] sm:$0xff]   ;;  %v1284_v26 = vld [vmem:[%s1609_s3 + $0x10] sm:$0xff]   ;;  %v1285_v27 = vld [vmem:[%s1608_s4 + $0x8] sm:$0xff]  }
   0x9   :  { %1201 = vmatpush3.bf16.msra.mxu1 %v1274_v16  ;;  %v1286_v28 = vld [vmem:[%s1609_s3 + $0x8] sm:$0xff]   ;;  %v1287_v29 = vld [vmem:[%s1608_s4] sm:$0xff]  }
   0xa   :  { %1202 = vmatprep.subr.bf16.mxu1 %v1297_v15  ;;  %v1288_v30 = vld [vmem:[%s1609_s3] sm:$0xff]  }
   0xb   :  { %v809_v31 = vld [vmem:[%s1610_s1] sm:$0xf] }
   0xc   :  { %v1502_v2 = vld [vmem:[%s1612_s6] sm:$0xf] }
   0xd   :  { %1203 = vmatpush3.bf16.msra.mxu1 %v1276_v18 }
   0xe   :  { %1153 = vmatmul.mubr.msk.bf16.gmra.mxu0 %vm85_vm1, %v1268_v9  ;;  %1171 = vmatmul.mubr.msk.bf16.gmra.mxu1 %vm85_vm1, %v1268_v9 }
   0xf   :  { %1156 = vmatprep.mubr.msk.bf16.mxu0 %vm85_vm1, %v1269_v10  ;;  %1174 = vmatprep.mubr.msk.bf16.mxu1 %vm85_vm1, %v1269_v10 }
  0x10   :  { %1204 = vmatprep.subr.bf16.mxu1 %v1297_v15 }
  0x11   :  { %1205 = vmatpush3.bf16.msra.mxu1 %v1278_v20 }
  0x12   :  { %1206 = vmatprep.subr.bf16.mxu1 %v1297_v15 }
  0x15   :  { %1207 = vmatpush3.bf16.msra.mxu1 %v1280_v22 }
  0x16   :  { %1157 = vmatmul.mubr.msk.bf16.gmra.mxu0 %vm85_vm1, %v1270_v11  ;;  %1175 = vmatmul.mubr.msk.bf16.gmra.mxu1 %vm85_vm1, %v1270_v11 }
  0x17   :  { %1160 = vmatprep.mubr.msk.bf16.mxu0 %vm85_vm1, %v1271_v12  ;;  %1178 = vmatprep.mubr.msk.bf16.mxu1 %vm85_vm1, %v1271_v12 }
  0x18   :  { %1208 = vmatprep.subr.bf16.mxu1 %v1297_v15 }
  0x19   :  { %1209 = vmatpush3.bf16.msra.mxu1 %v1282_v24 }
  0x1a   :  { %1210 = vmatprep.subr.bf16.mxu1 %v1297_v15 }
  0x1d   :  { %1211 = vmatpush3.bf16.msra.mxu1 %v1284_v26 }
  0x1e   :  { %1161 = vmatmul.mubr.msk.bf16.gmra.mxu0 %vm85_vm1, %v1272_v13  ;;  %1179 = vmatmul.mubr.msk.bf16.gmra.mxu1 %vm85_vm1, %v1272_v13 }
  0x1f   :  { %1184 = vmatprep.mubr.msk.bf16.mxu0 %vm85_vm1, %v1265_v4  ;;  %1212 = vmatprep.subr.bf16.mxu1 %v1297_v15 }
  0x20   :  { %1216 = vmatprep.mubr.msk.bf16.mxu1 %vm1298_vm2, %v1297_v15 }
  0x21   :  { %1213 = vmatpush3.bf16.msra.mxu1 %v1286_v28 }
  0x22   :  { %1214 = vmatprep.subr.bf16.mxu1 %v1297_v15 }
  0x25   :  { %1215 = vmatpush3.bf16.msra.mxu1 %v1288_v30 }
  0x26   :  { %1185 = vmatmul.mubr.msk.bf16.vlgmr.msra.gmra.mxu0 %vm85_vm1, %v1266_v5  ;;  %1240 = vmatprep.subr.bf16.mxu1 %v1297_v15 }
  0x27   :  { %1188 = vmatprep.mubr.msk.bf16.mxu0 %vm85_vm1, %v1267_v8  ;;  %1221 = vmatpush3.bf16.msra.mxu0 %v1273_v14 }
  0x28   :  { %1222 = vmatprep.subr.bf16.mxu0 %v1297_v15 }
  0x2b   :  { %1223 = vmatpush3.bf16.msra.mxu0 %v1275_v17 }
  0x2c   :  { %1224 = vmatprep.subr.bf16.mxu0 %v1297_v15 }
  0x2e   :  { %1189 = vmatmul.mubr.msk.bf16.gmra.mxu0 %vm85_vm1, %v1268_v9 }
  0x2f   :  { %1192 = vmatprep.mubr.msk.bf16.mxu0 %vm85_vm1, %v1269_v10  ;;  %1225 = vmatpush3.bf16.msra.mxu0 %v1277_v19  ;;  %v1506_v10 = vrot.slane %v1502_v2, %v563_v63 }
  0x30   :  { %1226 = vmatprep.subr.bf16.mxu0 %v1297_v15 }
  0x33   :  { %1227 = vmatpush3.bf16.msra.mxu0 %v1279_v21 }
  0x34   :  { %1228 = vmatprep.subr.bf16.mxu0 %v1297_v15 }
  0x36   :  { %1193 = vmatmul.mubr.msk.bf16.gmra.mxu0 %vm85_vm1, %v1270_v11 }
  0x37   :  { %1196 = vmatprep.mubr.msk.bf16.mxu0 %vm85_vm1, %v1271_v12  ;;  %1229 = vmatpush3.bf16.msra.mxu0 %v1281_v23 }
  0x38   :  { %1230 = vmatprep.subr.bf16.mxu0 %v1297_v15 }
  0x3b   :  { %1231 = vmatpush3.bf16.msra.mxu0 %v1283_v25 }
  0x3c   :  { %1232 = vmatprep.subr.bf16.mxu0 %v1297_v15 }
  0x3e   :  { %1197 = vmatmul.mubr.msk.bf16.gmra.mxu0 %vm85_vm1, %v1272_v13 }
  0x3f   :  { %1233 = vmatpush3.bf16.msra.mxu0 %v1285_v27  ;;  %1236 = vmatprep.mubr.msk.bf16.mxu0 %vm1298_vm2, %v1297_v15 }
  0x40   :  { %1234 = vmatprep.subr.bf16.mxu0 %v1297_v15 }
  0x43   :  { %1235 = vmatpush3.bf16.msra.mxu0 %v1287_v29 }
  0x46   :  { %1237 = vmatmul.mubr.bf16.vlgmr.msra.gmra.mxu0 %v809_v31 }
  0xc6   :  { %v1150_v32 = vpop.f32.mrf.mxu0  ;;  %v1168_v33 = vpop.f32.mrf.mxu1 }
  0xc7   :  { %v333_v58 = vrot.slane %v1168_v33, 1 }
  0xc8   :  { %v148_v34 = vpop.f32.mrf.mxu0  ;;  %v250_v35 = vpop.f32.mrf.mxu1 }
  0xc9   :  { %v330_v0 = vrot.slane %v250_v35, 1 }
  0xca   :  { %v1151_v36 = vpop.f32.mrf.mxu0  ;;  %v1169_v37 = vpop.f32.mrf.mxu1 }
  0xcb   :  { %v334_v59 = vrot.slane %v1169_v37, 1 }
  0xcc   :  { %v151_v38 = vpop.f32.mrf.mxu0  ;;  %v253_v39 = vpop.f32.mrf.mxu1 }
  0xcd   :  { %v331_v1 = vrot.slane %v253_v39, 1  ;;  %v335_v3 = vsel %vm329_vm3, %v333_v58, %v334_v59  ;;  %v373_v8 = vadd.f32 %v1151_v36, %v334_v59 }
  0xce   :  { %v1154_v40 = vpop.f32.mrf.mxu0  ;;  %v1172_v42 = vpop.f32.mrf.mxu1  ;;  %v372_v11 = vadd.f32 %v1150_v32, %v335_v3 }
  0xcf   :  { %v339_v4 = vrot.slane %v1172_v42, 1  ;;  %v332_v12 = vsel %vm329_vm3, %v330_v0, %v331_v1  ;;  %v371_v16 = vadd.f32 %v331_v1, %v151_v38 }
  0xd0   :  { %v1474_v41 = vpop.f32.mrf.mxu0  ;;  %v266_v45 = vpop.f32.mrf.mxu1  ;;  %v370_v26 = vadd.f32 %v332_v12, %v148_v34 }
  0xd1   :  { %v336_v17 = vrot.slane %v266_v45, 1 }
  0xd2   :  { %v1155_v43 = vpop.f32.mrf.mxu0  ;;  %v1173_v48 = vpop.f32.mrf.mxu1 }
  0xd3   :  { %v340_v5 = vrot.slane %v1173_v48, 1 }
  0xd4   :  { %v167_v44 = vpop.f32.mrf.mxu0  ;;  %v269_v51 = vpop.f32.mrf.mxu1 }
  0xd5   :  { %v341_v18 = vsel %vm329_vm3, %v339_v4, %v340_v5  ;;  %v337_v19 = vrot.slane %v269_v51, 1  ;;  %v377_v33 = vadd.f32 %v1155_v43, %v340_v5 }
  0xd6   :  { %v1476_v46 = vpop.f32.mrf.mxu0  ;;  %v1488_v55 = vpop.f32.mrf.mxu1  ;;  %v376_v32 = vadd.f32 %v1154_v40, %v341_v18 }
  0xd7   :  { %v338_v38 = vsel %vm329_vm3, %v336_v17, %v337_v19  ;;  %v375_v39 = vadd.f32 %v337_v19, %v167_v44  ;;  %v345_v48 = vrot.slane %v1488_v55, 1 }
  0xd8   :  { %v1478_v47 = vpop.f32.mrf.mxu0  ;;  %v1496_v61 = vpop.f32.mrf.mxu1 }
  0xd9   :  { %v342_v51 = vrot.slane %v1496_v61, 1 }
  0xda   :  { %v1480_v49 = vpop.f32.mrf.mxu0  ;;  %v1177_v7 = vpop.f32.mrf.mxu1 }
  0xdb   :  { %v346_v53 = vrot.slane %v1177_v7, 1 }
  0xdc   :  { %v1482_v50 = vpop.f32.mrf.mxu0  ;;  %v285_v21 = vpop.f32.mrf.mxu1 }
  0xdd   :  { %v343_v58 = vrot.slane %v285_v21, 1 }
  0xde   :  { %v1484_v52 = vpop.f32.mrf.mxu0  ;;  %v1515_v42 = vpop.f32.mrf.mxu1 }
  0xe0   :  { %v1486_v54 = vpop.f32.mrf.mxu0  ;;  %v1522_v5 = vpop.f32.mrf.mxu1 }
  0xe2   :  { %v1490_v56 = vpop.f32.mrf.mxu0 }
  0xe4   :  { %v1494_v60 = vpop.f32.mrf.mxu0 }
  0xe6   :  { %v1186_v62 = vpop.f32.mrf.mxu0 }
  0xe7   :  { %v508_v13 = vrot.slane %v1186_v62, 2 }
  0xe8   :  { %v425_v6 = vpop.f32.mrf.mxu0 }
  0xe9   :  { %v505_v22 = vrot.slane %v425_v6, 2 }
  0xea   :  { %v1187_v9 = vpop.f32.mrf.mxu0 }
  0xeb   :  { %v509_v14 = vrot.slane %v1187_v9, 2  ;;  %v347_v9 = vsel %vm329_vm3, %v345_v48, %v346_v53 }
  0xec   :  { %v428_v20 = vpop.f32.mrf.mxu0 }
  0xed   :  { %v510_v23 = vsel %vm504_vm4, %v508_v13, %v509_v14  ;;  %v548_v24 = vadd.f32 %v509_v14, %v373_v8  ;;  %v506_v25 = vrot.slane %v428_v20, 2  ;;  %v374_v8 = vadd.f32 %v338_v38, %v1474_v41 }
  0xee   :  { %v547_v27 = vadd.f32 %v510_v23, %v372_v11  ;;  %v1190_v28 = vpop.f32.mrf.mxu0  ;;  %v381_v11 = vadd.f32 %v1480_v49, %v346_v53  ;;  %v344_v14 = vsel %vm329_vm3, %v342_v51, %v343_v58  ;;  %v380_v41 = vadd.f32 %v1476_v46, %v347_v9  ;;  %v1181_v49 = vpop.f32.mrf.mxu1 }
  0xef   :  { %v568_v29 = vadd.f32 %v1506_v10, %v548_v24  ;;  %v507_v30 = vsel %vm504_vm4, %v505_v22, %v506_v25  ;;  %v546_v31 = vadd.f32 %v506_v25, %v371_v16  ;;  %v514_v62 = vrot.slane %v1190_v28, 2 }
  0xf0   :  { %v567_v35 = vadd.f32 %v1506_v10, %v547_v27  ;;  %v545_v36 = vadd.f32 %v507_v30, %v370_v26  ;;  %v441_v37 = vpop.f32.mrf.mxu0  ;;  %v379_v24 = vadd.f32 %v343_v58, %v1482_v50  ;;  %v378_v27 = vadd.f32 %v344_v14, %v1478_v47 }
  0xf1   :  { %v584_v45 = vmax.f32 %v568_v29, 0.0  ;;  %v566_v34 = vadd.f32 %v1506_v10, %v546_v31  ;;  %v511_v3 = vrot.slane %v441_v37, 2  ;;  %v351_v28 = vrot.slane %v1515_v42, 1 }
  0xf2   :  { %v565_v40 = vadd.f32 %v1506_v10, %v545_v36  ;;  %v1191_v43 = vpop.f32.mrf.mxu0  ;;  %v583_v0 = vmax.f32 %v567_v35, 0.0  ;;  %v348_v51 = vrot.slane %v1522_v5, 1  ;;  %v352_v53 = vrot.slane %v1181_v49, 1 }
  0xf3   :  { %v582_v59 = vmax.f32 %v566_v34, 0.0  ;;  %v515_v63 = vrot.slane %v1191_v43, 2  ;;  %v605_v44 = vsel %vm504_vm4, %v584_v45, -inf  ;;  %v301_v45 = vpop.f32.mrf.mxu1 }
  0xf4   :  { %v581_v1 = vmax.f32 %v565_v40, 0.0  ;;  %v444_v4 = vpop.f32.mrf.mxu0  ;;  %v606_v19 = vmax.f32 %v583_v0, %v605_v44  ;;  %v349_v44 = vrot.slane %v301_v45, 1 }
  0xf5   :  { %v597_v55 = vsel %vm504_vm4, %v582_v59, -inf  ;;  %v516_v61 = vsel %vm504_vm4, %v514_v62, %v515_v63  ;;  %v552_v6 = vadd.f32 %v515_v63, %v377_v33  ;;  %v512_v7 = vrot.slane %v444_v4, 2 }
  0xf6   :  { %v551_v12 = vadd.f32 %v516_v61, %v376_v32  ;;  %v1194_v13 = vpop.f32.mrf.mxu0  ;;  %v598_v20 = vmax.f32 %v581_v1, %v597_v55  ;;  %v607_v46 = vrot.slane %v606_v19, 4 }
  0xf7   :  { %v572_v16 = vadd.f32 %v1506_v10, %v552_v6  ;;  %v513_v17 = vsel %vm504_vm4, %v511_v3, %v512_v7  ;;  %v550_v18 = vadd.f32 %v512_v7, %v375_v39  ;;  %v520_v35 = vrot.slane %v1194_v13, 2 }
  0xf8   :  { %v571_v21 = vadd.f32 %v1506_v10, %v551_v12  ;;  %v549_v22 = vadd.f32 %v513_v17, %v374_v8  ;;  %v457_v23 = vpop.f32.mrf.mxu0  ;;  %v599_v37 = vrot.slane %v598_v20, 4  ;;  %v608_v1 = vmax.f32 %v606_v19, %v607_v46 }
  0xf9   :  { %v588_v25 = vmax.f32 %v572_v16, 0.0  ;;  %v570_v26 = vadd.f32 %v1506_v10, %v550_v18  ;;  %v517_v38 = vrot.slane %v457_v23, 2  ;;  %v353_v8 = vsel %vm329_vm3, %v351_v28, %v352_v53 }
  0xfa   :  { %v587_v29 = vmax.f32 %v571_v21, 0.0  ;;  %v569_v30 = vadd.f32 %v1506_v10, %v549_v22  ;;  %v1195_v31 = vpop.f32.mrf.mxu0  ;;  %v600_v3 = vmax.f32 %v598_v20, %v599_v37  ;;  %v385_v18 = vadd.f32 %v1490_v56, %v352_v53 }
  0xfb   :  { %v621_v32 = vsel %vm504_vm4, %v588_v25, -inf  ;;  %v586_v33 = vmax.f32 %v570_v26, 0.0  ;;  %v521_v36 = vrot.slane %v1195_v31, 2  ;;  %v350_v19 = vsel %vm329_vm3, %v348_v51, %v349_v44 }
  0xfc   :  { %v585_v50 = vmax.f32 %v569_v30, 0.0  ;;  %v460_v39 = vpop.f32.mrf.mxu0  ;;  %v622_v40 = vmax.f32 %v587_v29, %v621_v32  ;;  %v609_v20 = vrot.slane %v608_v1, 2  ;;  %v601_v21 = vrot.slane %v600_v3, 2 }
  0xfd   :  { %v613_v34 = vsel %vm504_vm4, %v586_v33, -inf  ;;  %v522_v47 = vsel %vm504_vm4, %v520_v35, %v521_v36  ;;  %v556_v42 = vadd.f32 %v521_v36, %v381_v11  ;;  %v518_v48 = vrot.slane %v460_v39, 2 }
  0xfe   :  { %v614_v43 = vmax.f32 %v585_v50, %v613_v34  ;;  %v1198_v58 = vpop.f32.mrf.mxu0  ;;  %v555_v59 = vadd.f32 %v522_v47, %v380_v41  ;;  %v623_v9 = vrot.slane %v622_v40, 4  ;;  %v384_v25 = vadd.f32 %v1484_v52, %v353_v8 }
  0xff   :  { %v576_v62 = vadd.f32 %v1506_v10, %v556_v42  ;;  %v519_v63 = vsel %vm504_vm4, %v517_v38, %v518_v48  ;;  %v554_v0 = vadd.f32 %v518_v48, %v379_v24  ;;  %v383_v26 = vadd.f32 %v349_v44, %v1494_v60 }
 0x100   :  { %v615_v4 = vrot.slane %v614_v43, 4  ;;  %v473_v55 = vpop.f32.mrf.mxu0  ;;  %v575_v61 = vadd.f32 %v1506_v10, %v555_v59  ;;  %v553_v7 = vadd.f32 %v519_v63, %v378_v27  ;;  %v624_v27 = vmax.f32 %v622_v40, %v623_v9 }
 0x101   :  { %v592_v6 = vmax.f32 %v576_v62, 0.0  ;;  %v574_v5 = vadd.f32 %v1506_v10, %v554_v0  ;;  %v526_v28 = vrot.slane %v1198_v58, 2  ;;  %v382_v32 = vadd.f32 %v350_v19, %v1486_v54 }
 0x102   :  { %v616_v11 = vmax.f32 %v614_v43, %v615_v4  ;;  %v1199_v12 = vpop.f32.mrf.mxu0  ;;  %v591_v13 = vmax.f32 %v575_v61, 0.0  ;;  %v573_v16 = vadd.f32 %v1506_v10, %v553_v7  ;;  %v610_v33 = vmax.f32 %v608_v1, %v609_v20 }
 0x103   :  { %v637_v14 = vsel %vm504_vm4, %v592_v6, -inf  ;;  %v590_v17 = vmax.f32 %v574_v5, 0.0  ;;  %v527_v31 = vrot.slane %v1199_v12, 2  ;;  %v602_v35 = vmax.f32 %v600_v3, %v601_v21 }
 0x104   :  { %v476_v22 = vpop.f32.mrf.mxu0  ;;  %v617_v23 = vrot.slane %v616_v11, 2  ;;  %v638_v41 = vmax.f32 %v591_v13, %v637_v14  ;;  %v589_v24 = vmax.f32 %v573_v16, 0.0  ;;  %v523_v36 = vrot.slane %v473_v55, 2 }
 0x105   :  { %v629_v49 = vsel %vm504_vm4, %v590_v17, -inf  ;;  %v524_v56 = vrot.slane %v476_v22, 2  ;;  %v528_v50 = vsel %vm504_vm4, %v526_v28, %v527_v31  ;;  %v560_v38 = vadd.f32 %v527_v31, %v385_v18 }
 0x106   :  { %v639_v29 = vrot.slane %v638_v41, 4  ;;  %v630_v30 = vmax.f32 %v589_v24, %v629_v49  ;;  %v618_v46 = vmax.f32 %v616_v11, %v617_v23  ;;  %v625_v39 = vrot.slane %v624_v27, 2 }
 0x107   :  { %v559_v45 = vadd.f32 %v528_v50, %v384_v25  ;;  %v525_v60 = vsel %vm504_vm4, %v523_v36, %v524_v56  ;;  %v580_v47 = vadd.f32 %v1506_v10, %v560_v38  ;;  %v611_v48 = vrot.slane %v610_v33, 1 }
 0x108   :  { %v631_v37 = vrot.slane %v630_v30, 4  ;;  %v640_v52 = vmax.f32 %v638_v41, %v639_v29  ;;  %v557_v42 = vadd.f32 %v525_v60, %v382_v32  ;;  %v603_v51 = vrot.slane %v602_v35, 1 }
 0x109   :  { %v579_v54 = vadd.f32 %v1506_v10, %v559_v45  ;;  %v558_v53 = vadd.f32 %v524_v56, %v383_v26  ;;  %v619_v40 = vrot.slane %v618_v46, 1  ;;  %v596_v58 = vmax.f32 %v580_v47, 0.0 }
 0x10a   :  { %v632_v34 = vmax.f32 %v630_v30, %v631_v37  ;;  %v577_v59 = vadd.f32 %v1506_v10, %v557_v42  ;;  %v626_v62 = vmax.f32 %v624_v27, %v625_v39  ;;  %v641_v63 = vrot.slane %v640_v52, 2 }
 0x10b   :  { %v595_v0 = vmax.f32 %v579_v54, 0.0  ;;  %v578_v44 = vadd.f32 %v1506_v10, %v558_v53  ;;  %v653_v3 = vsel %vm504_vm4, %v596_v58, -inf  ;;  %v604_v55 = vmax.f32 %v602_v35, %v603_v51  ;;  %v1289_v53 = vld [vmem:[%s1611_s5 + $0x38] sm:$0xff]   ;;  %v1291_v58 = vld [vmem:[%s1611_s5 + $0x28] sm:$0xff]  }
 0x10c   :  { %v633_v43 = vrot.slane %v632_v34, 2  ;;  %v593_v4 = vmax.f32 %v577_v59, 0.0  ;;  %v612_v7 = vmax.f32 %v610_v33, %v611_v48  ;;  %v620_v5 = vmax.f32 %v618_v46, %v619_v40  ;;  %v1292_v59 = vld [vmem:[%s1611_s5 + $0x20] sm:$0xff]  }
 0x10d   :  { %v654_v61 = vmax.f32 %v595_v0, %v653_v3  ;;  %v594_v6 = vmax.f32 %v578_v44, 0.0  ;;  %v627_v9 = vrot.slane %v626_v62, 1  ;;  %v642_v11 = vmax.f32 %v640_v52, %v641_v63  ;;  %v1294_v63 = vld [vmem:[%s1611_s5 + $0x10] sm:$0xff]   ;;  %v908_v0 = vpop.f32.mrf.mxu0 }
 0x10e   :  { %v634_v1 = vmax.f32 %v632_v34, %v633_v43  ;;  %v661_v16 = vpack.c.bf16 %v604_v55, %v604_v55  ;;  %v663_v18 = vpack.c.bf16 %v620_v5, %v620_v5  ;;  %v662_v20 = vpack.c.bf16 %v612_v7, %v612_v7  ;;  %v1290_v43 = vld [vmem:[%s1611_s5 + $0x30] sm:$0xff]   ;;  %v1296_v55 = vld [vmem:[%s1611_s5] sm:$0xff]  }
 0x10f   :  { %v655_v12 = vrot.slane %v654_v61, 4  ;;  %v645_v13 = vsel %vm504_vm4, %v594_v6, -inf  ;;  %v628_v21 = vmax.f32 %v626_v62, %v627_v9  ;;  %v643_v22 = vrot.slane %v642_v11, 1  ;;  %v1293_v62 = vld [vmem:[%s1611_s5 + $0x18] sm:$0xff]   ;;  %v1238_v44 = vpop.f32.mrf.mxu0 }
 0x110   :  { %v635_v8 = vrot.slane %v634_v1, 1  ;;  %v646_v14 = vmax.f32 %v593_v4, %v645_v13  ;;  %v697_v24 = vunpack.c.l.b16 %v661_v16  ;;  %v699_v25 = vunpack.c.l.b16 %v663_v18 }
 0x111   :  { %v656_v17 = vmax.f32 %v654_v61, %v655_v12  ;;  %v698_v28 = vunpack.c.l.b16 %v662_v20  ;;  %v664_v29 = vpack.c.bf16 %v628_v21, %v628_v21  ;;  %v644_v30 = vmax.f32 %v642_v11, %v643_v22  ;;  %v911_v3 = vpop.f32.mrf.mxu0 }
 0x112   :  { %v636_v10 = vmax.f32 %v634_v1, %v635_v8  ;;  %v647_v19 = vrot.slane %v646_v14, 4  ;;  %v1295_v1 = vld [vmem:[%s1611_s5 + $0x8] sm:$0xff]   ;;  %v687_v61 = vsub.s32 1, %v1492_v57  ;;  %v917_v7 = vsub.s32 2, %v1492_v57 }
 0x113   :  { %v657_v23 = vrot.slane %v656_v17, 2  ;;  %v706_v32 = vsel %vm705_vm5, %v698_v28, %v697_v24  ;;  %v700_v37 = vunpack.c.l.b16 %v664_v29  ;;  %v666_v50 = vpack.c.bf16 %v644_v30, %v644_v30  ;;  %v1239_v4 = vpop.f32.mrf.mxu0 }
 0x114   :  { %v648_v41 = vmax.f32 %v646_v14, %v647_v19  ;;  %v665_v26 = vpack.c.bf16 %v636_v10, %v636_v10  ;;  %v708_v35 = vsel %vm707_vm6, %v699_v25, %v706_v32  ;;  %v688_v6 = vrot.slane %v1502_v2, %v687_v61 }
 0x115   :  { %v658_v49 = vmax.f32 %v656_v17, %v657_v23  ;;  %v710_v52 = vsel %vm709_vm7, %v700_v37, %v708_v35  ;;  %v702_v34 = vunpack.c.l.b16 %v666_v50  ;;  %v918_v9 = vrot.slane %v1502_v2, %v917_v7 }
 0x116   :  { %v649_v27 = vrot.slane %v648_v41, 2  ;;  %v701_v36 = vunpack.c.l.b16 %v665_v26  ;;  %v939_v17 = vsub.s32 3, %v1492_v57 }
 0x117   :  { %v659_v31 = vrot.slane %v658_v49, 1 }
 0x118   :  { %v650_v56 = vmax.f32 %v648_v41, %v649_v27  ;;  %v712_v60 = vsel %vm711_vm8, %v701_v36, %v710_v52  ;;  %v940_v18 = vrot.slane %v1502_v2, %v939_v17 }
 0x119   :  { %v660_v33 = vmax.f32 %v658_v49, %v659_v31  ;;  %v714_v48 = vsel %vm713_vm9, %v702_v34, %v712_v60 }
 0x11a   :  { %v651_v46 = vrot.slane %v650_v56, 1 }
 0x11b   :  { %v668_v39 = vpack.c.bf16 %v660_v33, %v660_v33 }
 0x11c   :  { %v652_v38 = vmax.f32 %v650_v56, %v651_v46 }
 0x11d   :  { %v704_v42 = vunpack.c.l.b16 %v668_v39 }
 0x11e   :  { %v667_v45 = vpack.c.bf16 %v652_v38, %v652_v38 }
 0x120   :  { %v703_v47 = vunpack.c.l.b16 %v667_v45 }
 0x122   :  { %v716_v51 = vsel %vm715_vm10, %v703_v47, %v714_v48 }
 0x123   :  { %v718_v54 = vsel %vm717_vm11, %v704_v42, %v716_v51 }
 0x124   :  { %v719_v40 = vpack.c.b16 %v718_v54, %v718_v54 }
 0x126   :  { %1217 = vmatmul.mubr.bf16.vlgmr.msra.gmra.mxu1 %v719_v40 }
 0x127   :  { %1241 = vmatpush3.bf16.msra.mxu1 %v1289_v53  ;;  %1256 = vmatprep.mubr.msk.bf16.mxu1 %vm1298_vm2, %v1297_v15 }
 0x128   :  { %1242 = vmatprep.subr.bf16.mxu1 %v1297_v15 }
 0x12b   :  { %1243 = vmatpush3.bf16.msra.mxu1 %v1290_v43 }
 0x12c   :  { %1244 = vmatprep.subr.bf16.mxu1 %v1297_v15 }
 0x12f   :  { %1245 = vmatpush3.bf16.msra.mxu1 %v1291_v58 }
 0x130   :  { %1246 = vmatprep.subr.bf16.mxu1 %v1297_v15 }
 0x133   :  { %1247 = vmatpush3.bf16.msra.mxu1 %v1292_v59 }
 0x134   :  { %1248 = vmatprep.subr.bf16.mxu1 %v1297_v15 }
 0x137   :  { %1249 = vmatpush3.bf16.msra.mxu1 %v1293_v62 }
 0x138   :  { %1250 = vmatprep.subr.bf16.mxu1 %v1297_v15 }
 0x13b   :  { %1251 = vmatpush3.bf16.msra.mxu1 %v1294_v63 }
 0x13c   :  { %1252 = vmatprep.subr.bf16.mxu1 %v1297_v15 }
 0x13f   :  { %1253 = vmatpush3.bf16.msra.mxu1 %v1295_v1 }
 0x140   :  { %1254 = vmatprep.subr.bf16.mxu1 %v1297_v15 }
 0x143   :  { %1255 = vmatpush3.bf16.msra.mxu1 %v1296_v55 }
 0x1e6   :  { %v803_v5 = vpop.f32.mrf.mxu1 }
 0x1e7   :  { %v804_v8 = vadd.f32 %v803_v5, %v688_v6 }
 0x1e8   :  { %v1218_v11 = vpop.f32.mrf.mxu1 }
 0x1e9   :  { %v914_v12 = vadd.f32 %v908_v0, %v804_v8 }
 0x1ea   :  { %v806_v13 = vpop.f32.mrf.mxu1 }
 0x1eb   :  { %v919_v14 = vadd.f32 %v918_v9, %v914_v12 }
 0x1ec   :  { %v1219_v15 = vpop.f32.mrf.mxu1 }
 0x1ed   :  { %v920_v16 = vpack.c.bf16 %v919_v14, %v919_v14 }
 0x1ef   :  { %1257 = vmatmul.mubr.bf16.vlgmr.msra.gmra.mxu1 %v920_v16 }
 0x2af   :  { %v1023_v10 = vpop.f32.mrf.mxu1 }
 0x2b0   :  { %v1024_v19 = vadd.f32 %v1023_v10, %v940_v18 }
 0x2b1   :  { %v1258_v20 = vpop.f32.mrf.mxu1 }
 0x2b2   :  { %1029 = vst [vmem:[%s1613_s7] sm:$0xff] %v1024_v19 }
 0x2b3   :  { %v1026_v21 = vpop.f32.mrf.mxu1 }
 0x2b5   :  { %v1259_v22 = vpop.f32.mrf.mxu1 }

</bundles_post_ra>
